<compile_context>
chip_gen: v5e
topology: v5e:2x2
jax: 0.10.0
libtpu: 0.0.40
codegen_flags: <defaults>
</compile_context>

<pallas_src>
import functools

import jax
import jax.numpy as jnp
from jax.experimental import pallas as pl
from jax.experimental.pallas import tpu as pltpu


def action_head_embed_kernel(x_ref, w_ref, b_ref, o_ref, acc_ref, *, inv_mt):
    # x_ref : (n_blk, mt_blk, JC)  input block (any float dtype)
    # w_ref : (JC, H)              fc1.weight transposed (resident)
    # b_ref : (1, H)               fc1.bias (resident)
    # o_ref : (n_blk, H)           output block
    # acc_ref: (n_blk, JC) f32     running sum over the MT axis
    k = pl.program_id(1)

    @pl.when(k == 0)
    def _():
        acc_ref[...] = jnp.zeros_like(acc_ref)

    # Partial sum over this MT block; cast to f32 so bf16 inputs accumulate safely.
    acc_ref[...] += jnp.sum(x_ref[...].astype(jnp.float32), axis=1)

    @pl.when(k == pl.num_programs(1) - 1)
    def _():
        pooled = acc_ref[...] * inv_mt                          # (n_blk, JC)
        # fc1: pooled @ W^T + b  (W passed pre-transposed)
        y = jnp.dot(pooled, w_ref[...],
                    preferred_element_type=jnp.float32)         # (n_blk, H)
        y = y + b_ref[...]
        # F.normalize(dim=-1): y / max(||y||, 1e-12) == y * rsqrt(max(||y||^2, 1e-24))
        sumsq = jnp.sum(y * y, axis=-1, keepdims=True)
        y = y * jax.lax.rsqrt(jnp.maximum(sumsq, 1e-24))
        o_ref[...] = y.astype(o_ref.dtype)


def _round_up(a, b):
    return (a + b - 1) // b * b


def _choose_block(total, target):
    """Return (block, padded_total). Whole axis if it fits `target`,
    else a multiple-of-8 block with the axis padded up to a multiple."""
    if total <= target:
        return total, total
    blk = max(8, (target // 8) * 8)
    return blk, _round_up(total, blk)


def action_head_embed(feat, w_t, b, *, n_blk=None, mt_blk=None,
                      x_buffer_budget_bytes=4 * 1024 * 1024):
    """feat: (N, M, T, J, C); w_t: (J*C, H) = fc1.weight.T; b: (H,) -> (N, H) f32."""
    N, M, T, J, C = feat.shape
    MT = M * T
    JC = J * C
    H = w_t.shape[1]
    itemsize = jnp.dtype(feat.dtype).itemsize

    # ---- block sizing ------------------------------------------------------
    mt_target = 512 if mt_blk is None else mt_blk
    mt_blk, MT_pad = _choose_block(MT, mt_target)

    if n_blk is None:
        n_target = x_buffer_budget_bytes // max(1, mt_blk * JC * itemsize)
        n_target = int(min(128, max(8, n_target)))
    else:
        n_target = n_blk
    n_blk, N_pad = _choose_block(N, n_target)

    # ---- glue reshapes / padding (no compute beyond zero-fill) -------------
    # (N, M, T, J, C) -> (N, M*T, J*C); feature index j*C + c matches the
    # PyTorch permute(0,1,3,4,2) + mean(T) + reshape(N, M, -1) layout.
    x = feat.reshape(N, MT, JC)
    if N_pad != N or MT_pad != MT:
        x = jnp.pad(x, ((0, N_pad - N), (0, MT_pad - MT), (0, 0)))
    b2 = b.reshape(1, H)

    grid = (N_pad // n_blk, MT_pad // mt_blk)

    # ---- VMEM budget (explicit, generation-safe) ----------------------------
    x_blk_bytes = n_blk * mt_blk * JC * itemsize
    est = (2 * x_blk_bytes            # double-buffered x stream
           + 2 * JC * H * 4           # resident weight
           + 2 * H * 4                # resident bias
           + 2 * n_blk * H * 4        # output block
           + n_blk * JC * 4)          # accumulator scratch
    vmem_limit = int(min(max(2 * est, 16 * 1024 * 1024), 64 * 1024 * 1024))

    kernel = functools.partial(action_head_embed_kernel, inv_mt=1.0 / float(MT))

    out = pl.pallas_call(
        kernel,
        out_shape=jax.ShapeDtypeStruct((N_pad, H), jnp.float32),
        grid_spec=pltpu.PrefetchScalarGridSpec(
            num_scalar_prefetch=0,
            grid=grid,
            in_specs=[
                pl.BlockSpec((n_blk, mt_blk, JC), lambda i, k: (i, k, 0)),
                pl.BlockSpec((JC, H), lambda i, k: (0, 0)),   # resident weight
                pl.BlockSpec((1, H), lambda i, k: (0, 0)),    # resident bias
            ],
            out_specs=pl.BlockSpec((n_blk, H), lambda i, k: (i, 0)),
            scratch_shapes=[pltpu.VMEM((n_blk, JC), jnp.float32)],
        ),
        compiler_params=pltpu.CompilerParams(
            dimension_semantics=("parallel", "arbitrary"),
            vmem_limit_bytes=vmem_limit,
        ),
    )(x, w_t, b2)

    return out[:N]


def reference(feat, w_t, b):
    """Pure-JAX reference mirroring the PyTorch forward."""
    N, M, T, J, C = feat.shape
    f = jnp.transpose(feat.astype(jnp.float32), (0, 1, 3, 4, 2))  # (N, M, J, C, T)
    f = jnp.mean(f, axis=-1)                                      # (N, M, J, C)
    f = f.reshape(N, M, -1)                                       # (N, M, J*C)
    f = jnp.mean(f, axis=1)                                       # (N, J*C)
    y = f @ w_t + b                                               # (N, H)
    n = jnp.sqrt(jnp.sum(y * y, axis=-1, keepdims=True))
    return y / jnp.maximum(n, 1e-12)


if __name__ == "__main__":
    # Small shapes consistent with the module:
    # dim_rep(C)=32, num_joints(J)=4 -> fc1 in = J*C = 128, hidden = 64.
    N, M, T, J, C = 2, 2, 8, 4, 32
    H = 64
    JC = J * C

    key = jax.random.PRNGKey(0)
    k_x, k_w, k_b = jax.random.split(key, 3)

    feat = jax.random.normal(k_x, (N, M, T, J, C), dtype=jnp.float32)

    # Deterministic fc1 params (PyTorch-style uniform(-1/sqrt(fan_in), ...)).
    bound = 1.0 / (JC ** 0.5)
    w = jax.random.uniform(k_w, (H, JC), minval=-bound, maxval=bound,
                           dtype=jnp.float32)      # nn.Linear weight layout
    b = jax.random.uniform(k_b, (H,), minval=-bound, maxval=bound,
                           dtype=jnp.float32)
    w_t = jnp.asarray(w.T)                          # (JC, H) for the kernel

    ref = reference(feat, w_t, b)

    # 1) default block sizing (single MT block at these tiny shapes)
    out = jax.block_until_ready(action_head_embed(feat, w_t, b))
    assert out.shape == (N, H)
    assert jnp.allclose(out, ref, atol=1e-5, rtol=1e-5), (
        f"default path: max abs err {jnp.max(jnp.abs(out - ref))}")

    # 2) forced tiling to exercise the streaming accumulator / epilogue path
    out_t = jax.block_until_ready(action_head_embed(feat, w_t, b, mt_blk=8))
    assert jnp.allclose(out_t, ref, atol=1e-5, rtol=1e-5), (
        f"tiled path: max abs err {jnp.max(jnp.abs(out_t - ref))}")

    print("KERNEL_OK")
</pallas_src>

<mosaic_0001>
module attributes {stable_mosaic.version = 11 : i64} {
  func.func @action_head_embed_kernel(%arg0: i32, %arg1: i32, %arg2: memref<2x16x128xf32, #tpu.memory_space<vmem>>, %arg3: memref<128x64xf32, #tpu.memory_space<vmem>>, %arg4: memref<1x64xf32, #tpu.memory_space<vmem>>, %arg5: memref<2x64xf32, #tpu.memory_space<vmem>>, %arg6: memref<2x128xf32, #tpu.memory_space<vmem>>) attributes {dimension_semantics = [#tpu.dimension_semantics<parallel>, #tpu.dimension_semantics<arbitrary>], iteration_bounds = array<i64: 1, 1>, scalar_prefetch = 0 : i64, scratch_operands = 1 : i64, tpu.core_type = #tpu.core_type<tc>, window_params = [{transform_indices = @transform_0, window_bounds = array<i64: 2, 16, 128>}, {pipeline_mode = #tpu.pipeline_mode<synchronous>, transform_indices = @transform_1, window_bounds = array<i64: 128, 64>}, {pipeline_mode = #tpu.pipeline_mode<synchronous>, transform_indices = @transform_2, window_bounds = array<i64: 1, 64>}, {transform_indices = @transform_3, window_bounds = array<i64: 2, 64>}]} {
    %c0_i32 = arith.constant 0 : i32
    %0 = arith.cmpi eq, %arg1, %c0_i32 : i32
    %1 = arith.extui %0 : i1 to i32
    %c0_i32_0 = arith.constant 0 : i32
    %2 = arith.cmpi ne, %1, %c0_i32_0 : i32
    scf.if %2 {
      %cst_9 = arith.constant 0.000000e+00 : f32
      %11 = vector.broadcast %cst_9 : f32 to vector<2x128xf32>
      %c0_10 = arith.constant 0 : index
      %c0_11 = arith.constant 0 : index
      %12 = vector.load %arg6[%c0_10, %c0_11] : memref<2x128xf32, #tpu.memory_space<vmem>>, vector<2x128xf32>
      tpu.vector_store %arg6[%c0_10, %c0_11], %11 {strides = array<i32>} : memref<2x128xf32, #tpu.memory_space<vmem>>, vector<2x128xf32>,
    } else {
    }
    %c0 = arith.constant 0 : index
    %c0_1 = arith.constant 0 : index
    %3 = vector.load %arg6[%c0, %c0_1] : memref<2x128xf32, #tpu.memory_space<vmem>>, vector<2x128xf32>
    %c0_2 = arith.constant 0 : index
    %c0_3 = arith.constant 0 : index
    %c0_4 = arith.constant 0 : index
    %4 = vector.load %arg2[%c0_2, %c0_3, %c0_4] : memref<2x16x128xf32, #tpu.memory_space<vmem>>, vector<2x16x128xf32>
    %cst = arith.constant dense<0.000000e+00> : vector<2x128xf32>
    %5 = vector.multi_reduction <add>, %4, %cst [1] : vector<2x16x128xf32> to vector<2x128xf32>
    %6 = arith.addf %3, %5 : vector<2x128xf32>
    %c0_5 = arith.constant 0 : index
    %c0_6 = arith.constant 0 : index
    %7 = vector.load %arg6[%c0_5, %c0_6] : memref<2x128xf32, #tpu.memory_space<vmem>>, vector<2x128xf32>
    tpu.vector_store %arg6[%c0_5, %c0_6], %6 {strides = array<i32>} : memref<2x128xf32, #tpu.memory_space<vmem>>, vector<2x128xf32>,
    %c0_i32_7 = arith.constant 0 : i32
    %8 = arith.cmpi eq, %arg1, %c0_i32_7 : i32
    %9 = arith.extui %8 : i1 to i32
    %c0_i32_8 = arith.constant 0 : i32
    %10 = arith.cmpi ne, %9, %c0_i32_8 : i32
    scf.if %10 {
      %c0_9 = arith.constant 0 : index
      %c0_10 = arith.constant 0 : index
      %11 = vector.load %arg6[%c0_9, %c0_10] : memref<2x128xf32, #tpu.memory_space<vmem>>, vector<2x128xf32>
      %cst_11 = arith.constant 6.250000e-02 : f32
      %12 = vector.broadcast %cst_11 : f32 to vector<2x128xf32>
      %13 = arith.mulf %11, %12 : vector<2x128xf32>
      %c0_12 = arith.constant 0 : index
      %c0_13 = arith.constant 0 : index
      %14 = vector.load %arg3[%c0_12, %c0_13] : memref<128x64xf32, #tpu.memory_space<vmem>>, vector<128x64xf32>
      %cst_14 = arith.constant dense<0.000000e+00> : vector<2x64xf32>
      %15 = tpu.matmul %13, %14, %cst_14 {dimension_numbers = #tpu.dot_dimension_numbers<[1], [0], [0], [1], [0, 0, 1, 1], [], []>} : vector<2x128xf32>, vector<128x64xf32>, vector<2x64xf32> -> vector<2x64xf32>
      %c0_15 = arith.constant 0 : index
      %c0_16 = arith.constant 0 : index
      %16 = vector.load %arg4[%c0_15, %c0_16] : memref<1x64xf32, #tpu.memory_space<vmem>>, vector<1x64xf32>
      %17 = vector.broadcast %16 : vector<1x64xf32> to vector<2x64xf32>
      %18 = arith.addf %15, %17 : vector<2x64xf32>
      %19 = arith.mulf %18, %18 : vector<2x64xf32>
      %cst_17 = arith.constant dense<0.000000e+00> : vector<2xf32>
      %20 = vector.multi_reduction <add>, %19, %cst_17 [1] : vector<2x64xf32> to vector<2xf32>
      %21 = vector.shape_cast %20 : vector<2xf32> to vector<2x1xf32>
      %cst_18 = arith.constant 1.000000e-24 : f32
      %22 = vector.broadcast %cst_18 : f32 to vector<2x1xf32>
      %23 = arith.maximumf %21, %22 : vector<2x1xf32>
      %24 = math.rsqrt %23 : vector<2x1xf32>
      %25 = vector.broadcast %24 : vector<2x1xf32> to vector<2x64xf32>
      %26 = arith.mulf %18, %25 : vector<2x64xf32>
      %c0_19 = arith.constant 0 : index
      %c0_20 = arith.constant 0 : index
      %27 = vector.load %arg5[%c0_19, %c0_20] : memref<2x64xf32, #tpu.memory_space<vmem>>, vector<2x64xf32>
      tpu.vector_store %arg5[%c0_19, %c0_20], %26 {strides = array<i32>} : memref<2x64xf32, #tpu.memory_space<vmem>>, vector<2x64xf32>,
    } else {
    }
    return
  }
  func.func @transform_0(%arg0: i32, %arg1: i32) -> (i32, i32, i32) {
    %c0_i32 = arith.constant 0 : i32
    %c0_i32_0 = arith.constant 0 : i32
    return %arg0, %arg1, %c0_i32 : i32, i32, i32
  }
  func.func @transform_1(%arg0: i32, %arg1: i32) -> (i32, i32) {
    %c0_i32 = arith.constant 0 : i32
    %c0_i32_0 = arith.constant 0 : i32
    %c0_i32_1 = arith.constant 0 : i32
    return %c0_i32, %c0_i32_0 : i32, i32
  }
  func.func @transform_2(%arg0: i32, %arg1: i32) -> (i32, i32) {
    %c0_i32 = arith.constant 0 : i32
    %c0_i32_0 = arith.constant 0 : i32
    %c0_i32_1 = arith.constant 0 : i32
    return %c0_i32, %c0_i32_0 : i32, i32
  }
  func.func @transform_3(%arg0: i32, %arg1: i32) -> (i32, i32) {
    %c0_i32 = arith.constant 0 : i32
    %c0_i32_0 = arith.constant 0 : i32
    return %arg0, %c0_i32 : i32, i32
  }
}

</mosaic_0001>

<bundles_post_ra>
// kernel: tpu_custom_call.1
= control target key start
LH: loop header
LB: loop body
LE: loop exit
PB: predicated region body
PF: predicated region fallthrough
CT: control target
= control target key end

     0   :  { %v156_v2 = vmov 0.0   ;;  %s246_s0 = inlined_call_operand.vmem [shape: f32[2,16,128], index: 0, kind: input, shape index: {}]   ;;  %s247_s1 = inlined_call_operand.vmem [shape: f32[128,64], index: 1, kind: input, shape index: {}]   ;;  %s248_s2 = inlined_call_operand.vmem [shape: f32[1,64], index: 2, kind: input, shape index: {}]   ;;  %s249_s3 = inlined_call_operand.hbm [shape: f32[2,64], index: 3, kind: output, shape index: {}]  }
   0x1   :  { %v66_v0 = vld [vmem:[%s247_s1 + $0x78] sm:$0xff]  ;;  %v65_v1 = vld [vmem:[%s247_s1 + $0x70] sm:$0xff]  ;;  %19 = vst [vmem:[#allocation2] sm:$0x3] %v156_v2  ;;  %v64_v3 = vld [vmem:[%s247_s1 + $0x68] sm:$0xff] }
   0x2   :  { %71 = vmatpush.msra.mxu0 %v66_v0  ;;  %v63_v4 = vld [vmem:[%s247_s1 + $0x60] sm:$0xff]  ;;  %v62_v5 = vld [vmem:[%s247_s1 + $0x58] sm:$0xff]  ;;  %v22_v7 = vld [vmem:[%s246_s0 + $0x8] sm:$0xff] }
   0x3   :  { %v21_v6 = vld [vmem:[%s246_s0] sm:$0xff]  ;;  %v23_v8 = vld [vmem:[%s246_s0 + $0x10] sm:$0xff]  ;;  %v24_v9 = vld [vmem:[%s246_s0 + $0x18] sm:$0xff] }
   0x4   :  { %72 = vmatpush.msra.mxu0 %v65_v1  ;;  %v25_v10 = vadd.f32 %v22_v7, %v21_v6  ;;  %v32_v11 = vadd.f32 %v24_v9, %v23_v8 }
   0x6   :  { %73 = vmatpush.msra.mxu0 %v64_v3 }
   0x8   :  { %74 = vmatpush.msra.mxu0 %v63_v4 }
   0x9   :  { %8 = vsyncpa [#allocation4], 0  ;;  %v61_v12 = vld [vmem:[%s247_s1 + $0x50] sm:$0xff]  ;;  %v26_v13 = vrot.slane %v25_v10, 4  ;;  %v33_v14 = vrot.slane %v32_v11, 4  ;;  %v60_v15 = vld [vmem:[%s247_s1 + $0x48] sm:$0xff] }
   0xa   :  { %75 = vmatpush.msra.mxu0 %v62_v5  ;;  %v59_v18 = vld [vmem:[%s247_s1 + $0x40] sm:$0xff]  ;;  %v58_v21 = vld [vmem:[%s247_s1 + $0x38] sm:$0xff]  ;;  %v57_v24 = vld [vmem:[%s247_s1 + $0x30] sm:$0xff]  ;;  %vm41_vm0 = vcmask 1041409   ;;  %vm92_vm1 = vcmask 517120   ;;  %s116_s28 = sshll.u32 %s249_s3, 4  ;;  %s117_s28 = int_to_ptr.hbm [resolvable:$true] %s116_s28 }
   0xb   :  { %v27_v16 = vadd.f32 %v26_v13, %v25_v10  ;;  %v34_v17 = vadd.f32 %v33_v14, %v32_v11  ;;  %v56_v27 = vld [vmem:[%s247_s1 + $0x28] sm:$0xff]  ;;  %v20_v29 = vld [vmem:[#allocation2] sm:$0x3]  ;;  %v54_v33 = vld [vmem:[%s247_s1 + $0x18] sm:$0xff] }
   0xc   :  { %76 = vmatpush.msra.mxu0 %v61_v12  ;;  %v55_v31 = vld [vmem:[%s247_s1 + $0x20] sm:$0xff]  ;;  %v53_v35 = vld [vmem:[%s247_s1 + $0x10] sm:$0xff]  ;;  %v52_v36 = vld [vmem:[%s247_s1 + $0x8] sm:$0xff] }
   0xd   :  { %v28_v19 = vrot.slane %v27_v16, 2  ;;  %v35_v20 = vrot.slane %v34_v17, 2  ;;  %v51_v37 = vld [vmem:[%s247_s1] sm:$0xff]  ;;  %s157_s1 = smov [#allocation3]  }
   0xe   :  { %77 = vmatpush.msra.mxu0 %v60_v15  ;;  %v127_v40 = vld [vmem:[%s248_s2] ss:$0 sm:$0xff]  ;;  %s114_s2 = sshll.u32 %s157_s1, 4  ;;  %s115_s2 = int_to_ptr.vmem [resolvable:$true] %s114_s2 }
   0xf   :  { %v29_v22 = vadd.f32 %v28_v19, %v27_v16  ;;  %v36_v23 = vadd.f32 %v35_v20, %v34_v17 }
  0x10   :  { %78 = vmatpush.msra.mxu0 %v59_v18 }
  0x11   :  { %v30_v25 = vrot.slane %v29_v22, 1  ;;  %v37_v26 = vrot.slane %v36_v23, 1 }
  0x12   :  { %79 = vmatpush.msra.mxu0 %v58_v21 }
  0x13   :  { %v31_v28 = vadd.f32 %v30_v25, %v29_v22  ;;  %v38_v30 = vadd.f32 %v37_v26, %v36_v23 }
  0x14   :  { %80 = vmatpush.msra.mxu0 %v57_v24 }
  0x15   :  { %v42_v32 = vsel %vm41_vm0, %v38_v30, %v31_v28 }
  0x16   :  { %81 = vmatpush.msra.mxu0 %v56_v27  ;;  %v44_v34 = vadd.f32 %v42_v32, %v20_v29 }
  0x18   :  { %82 = vmatpush.msra.mxu0 %v55_v31  ;;  %45 = vst [vmem:[#allocation2] sm:$0x3] %v44_v34 }
  0x1a   :  { %83 = vmatpush.msra.mxu0 %v54_v33 }
  0x1c   :  { %84 = vmatpush.msra.mxu0 %v53_v35 }
  0x1e   :  { %85 = vmatpush.msra.mxu0 %v52_v36 }
  0x1f   :  { %v49_v38 = vld [vmem:[#allocation2] sm:$0x3] }
  0x20   :  { %86 = vmatpush.msra.mxu0 %v51_v37  ;;  %v50_v39 = vmul.f32 0.0625, %v49_v38 }
  0x22   :  { %87 = vmatmul.f32.vlgmr.msra.gmra.mxu0 %v50_v39 }
  0x9f   :  { %v88_v41 = vpop.f32.mrf.mxu0 }
  0xa0   :  { %v89_v42 = vadd.f32 %v127_v40, %v88_v41 }
  0xa2   :  { %v91_v43 = vmul.f32 %v89_v42, %v89_v42 }
  0xa4   :  { %v93_v44 = vsel %vm92_vm1, %v91_v43, 0.0 }
  0xa5   :  { %94 = vadd.xlane.f32.xlu0 %v93_v44 }
 0x118   :  { %v95_v45 = vpop.xlane.xlu0 %94 }
 0x119   :  { %v96_v46 = vmax.f32 %v95_v45, 1e-24 }
 0x11b   :  { %128 = vrsqrt.f32 %v96_v46  ;;  %vm103_vm3 = vweird.f32 %v96_v46 }
 0x121   :  { %v129_v47 = vpop.eup %128 }
 0x122   :  { %v98_v48 = vmul.f32 %v129_v47, %v96_v46  ;;  %vm104_vm2 = vweird.f32 %v129_v47 }
 0x123   :  { %vm105_vm4 = vmor %vm103_vm3, %vm104_vm2 }
 0x124   :  { %v99_v49 = vmul.f32 %v129_v47, %v98_v48 }
 0x126   :  { %v100_v50 = vmul.f32 0.5, %v99_v49 }
 0x128   :  { %v101_v51 = vsub.f32 1.5, %v100_v50 }
 0x12a   :  { %v102_v52 = vmul.f32 %v129_v47, %v101_v51 }
 0x12c   :  { %v106_v53 = vsel %vm105_vm4, %v129_v47, %v102_v52 }
 0x12d   :  { %v107_v54 = vmul.f32 %v106_v53, %v89_v42 }
 0x12f   :  { %108 = vst.msk [vmem:[#allocation3] sm:$0x3] %vm92_vm1, %v107_v54 }
 0x130   :  { %119 = dma.vmem_to_hbm [thread:$0]  %s115_s2, 32, %s117_s28, [#allocation4]  }
 0x131   :  { %154 = dma.done.wait [#allocation4], 32  }
 0x132   :  { %155 = vsyncadd [#allocation4], 4294967264 }
 0x133   :  { %124 = vsyncpa [#allocation4], 1 }

</bundles_post_ra>
